<compile_context>
chip_gen: v6e
topology: v6e:2x2x1
jax: 0.10.0
libtpu: 0.0.40
codegen_flags: <defaults>
</compile_context>

<pallas_src>
import functools

import jax
import jax.numpy as jnp
from jax.experimental import pallas as pl
from jax.experimental.pallas import tpu as pltpu


def _round_up(x, m):
    return (x + m - 1) // m * m


def _cdiv(a, b):
    return -(-a // b)


def _mlp_kernel(x_ref, w1_ref, b1_ref, w2_ref, b2_ref, o_ref):
    # x_ref:  (TB, D_in) f32  (unpadded; cast to bf16 here)
    # w1_ref: (D_in, Hp) bf16   b1_ref: (1, Hp) f32
    # w2_ref: (Hp, C)   bf16   b2_ref: (1, C)  f32
    # o_ref:  (TB, C)   f32   (unpadded, lane count == full array dim)
    x = x_ref[...].astype(w1_ref.dtype)
    h = jnp.dot(x, w1_ref[...], preferred_element_type=jnp.float32)
    h = jnp.maximum(h + b1_ref[...], 0.0)                      # (TB, Hp) f32
    y = jnp.dot(h.astype(w2_ref.dtype), w2_ref[...],
                preferred_element_type=jnp.float32)
    o_ref[...] = (y + b2_ref[...]).astype(o_ref.dtype)         # (TB, C)


def prepare_params(w1, b1, w2, b2, *, compute_dtype=jnp.bfloat16):
    """One-time weight prep (hoisted out of the per-forward path).

    Pads the hidden dim to a 128-lane multiple (grid-invariant, VMEM-resident,
    so the pad costs one DMA ever) and casts weights to bf16.  Padded hidden
    columns are zero -> ReLU(0+0)=0 -> contribute 0 through w2's zero rows.
    """
    D_in, H = w1.shape
    C = w2.shape[1]
    Hp = _round_up(H, 128)
    w1p = jnp.zeros((D_in, Hp), compute_dtype).at[:, :H].set(
        w1.astype(compute_dtype))
    b1p = jnp.zeros((1, Hp), jnp.float32).at[:, :H].set(b1.astype(jnp.float32))
    w2p = jnp.zeros((Hp, C), compute_dtype).at[:H, :].set(
        w2.astype(compute_dtype))
    b2p = b2.astype(jnp.float32).reshape(1, C)
    return w1p, b1p, w2p, b2p


@functools.partial(jax.jit, static_argnames=("block_b",))
def neural_net2_forward(x, w1p, b1p, w2p, b2p, *, block_b=1024):
    """x: (B, D_in) f32; prepared params from prepare_params()."""
    B, D_in = x.shape
    Hp = w1p.shape[1]
    C = w2p.shape[1]

    # Batch tiling: big tiles (per-step overhead ~0.35us), but keep >= 2 grid
    # steps whenever the batch allows so v7x megacore has work for both TCs.
    num_tiles = max(1, _cdiv(B, block_b))
    if num_tiles == 1 and B >= 16:
        num_tiles = 2
    TB = _round_up(_cdiv(B, num_tiles), 8)
    Bp = _round_up(B, TB)
    grid = (Bp // TB,)

    # Only batch-pad when needed (extra rows compute garbage, sliced off).
    xp = x if Bp == B else jnp.zeros((Bp, D_in), x.dtype).at[:B].set(x)

    flops = 2 * Bp * (D_in * Hp + Hp * C)
    bytes_accessed = (Bp * D_in * 4 + w1p.size * 2 + w2p.size * 2
                      + b1p.size * 4 + b2p.size * 4 + Bp * C * 4)

    out = pl.pallas_call(
        _mlp_kernel,
        out_shape=jax.ShapeDtypeStruct((Bp, C), jnp.float32),
        grid=grid,
        in_specs=[
            # Batch-tiled activations, unpadded feature dim (== full array dim).
            pl.BlockSpec((TB, D_in), lambda i: (i, 0)),
            # Grid-invariant weights/biases: constant index maps keep them
            # VMEM-resident across all grid steps (no re-DMA).
            pl.BlockSpec((D_in, Hp), lambda i: (0, 0)),
            pl.BlockSpec((1, Hp), lambda i: (0, 0)),
            pl.BlockSpec((Hp, C), lambda i: (0, 0)),
            pl.BlockSpec((1, C), lambda i: (0, 0)),
        ],
        # Unpadded output block: last dim equals full array dim (legal).
        out_specs=pl.BlockSpec((TB, C), lambda i: (i, 0)),
        compiler_params=pltpu.CompilerParams(
            # Independent batch tiles -> parallel axis (2x on v7x megacore).
            dimension_semantics=("parallel",),
        ),
        cost_estimate=pl.CostEstimate(
            flops=flops, transcendentals=0, bytes_accessed=bytes_accessed),
    )(xp, w1p, b1p, w2p, b2p)
    return out[:B] if Bp != B else out


def init_params(key, input_size, hidden_size, num_classes):
    # Deterministic init mimicking nn.Linear's U(-1/sqrt(fan_in), 1/sqrt(fan_in)).
    k1, k2, k3, k4 = jax.random.split(key, 4)
    bound1 = 1.0 / jnp.sqrt(jnp.float32(input_size))
    bound2 = 1.0 / jnp.sqrt(jnp.float32(hidden_size))
    w1 = jax.random.uniform(k1, (input_size, hidden_size), jnp.float32,
                            -bound1, bound1)
    b1 = jax.random.uniform(k2, (1, hidden_size), jnp.float32, -bound1, bound1)
    w2 = jax.random.uniform(k3, (hidden_size, num_classes), jnp.float32,
                            -bound2, bound2)
    b2 = jax.random.uniform(k4, (1, num_classes), jnp.float32, -bound2, bound2)
    return w1, b1, w2, b2


def _reference(x, w1, b1, w2, b2):
    # Plain-JAX reference with the same bf16-operand / f32-accumulate math.
    h = jnp.dot(x.astype(jnp.bfloat16), w1.astype(jnp.bfloat16),
                preferred_element_type=jnp.float32) + b1
    h = jnp.maximum(h, 0.0)
    y = jnp.dot(h.astype(jnp.bfloat16), w2.astype(jnp.bfloat16),
                preferred_element_type=jnp.float32) + b2
    return y


if __name__ == "__main__":
    input_size = 32
    hidden_size = 64
    num_classes = 4

    key = jax.random.PRNGKey(0)
    kx, kp, kx2 = jax.random.split(key, 3)
    w1, b1, w2, b2 = init_params(kp, input_size, hidden_size, num_classes)

    # Weight prep done once, outside the per-forward hot path.
    w1p, b1p, w2p, b2p = prepare_params(w1, b1, w2, b2)
    jax.block_until_ready((w1p, b1p, w2p, b2p))

    # Multi-tile path (grid of 2 parallel batch tiles).
    batch = 512
    x = jax.random.normal(kx, (batch, input_size), jnp.float32)
    out = neural_net2_forward(x, w1p, b1p, w2p, b2p)
    jax.block_until_ready(out)
    ref = _reference(x, w1, b1, w2, b2)
    assert out.shape == (batch, num_classes)
    assert jnp.allclose(out, ref, atol=1e-2, rtol=1e-2)

    # Small / ragged batch to exercise the batch-padding + row-slice path.
    batch2 = 10
    x2 = jax.random.normal(kx2, (batch2, input_size), jnp.float32)
    out2 = neural_net2_forward(x2, w1p, b1p, w2p, b2p)
    jax.block_until_ready(out2)
    ref2 = _reference(x2, w1, b1, w2, b2)
    assert out2.shape == (batch2, num_classes)
    assert jnp.allclose(out2, ref2, atol=1e-2, rtol=1e-2)

    print("KERNEL_OK")
</pallas_src>

<mosaic_0001>
module attributes {stable_mosaic.version = 11 : i64} {
  func.func @_mlp_kernel(%arg0: i32, %arg1: memref<256x32xf32, #tpu.memory_space<vmem>>, %arg2: memref<32x128xbf16, #tpu.memory_space<vmem>>, %arg3: memref<1x128xf32, #tpu.memory_space<vmem>>, %arg4: memref<128x4xbf16, #tpu.memory_space<vmem>>, %arg5: memref<1x4xf32, #tpu.memory_space<vmem>>, %arg6: memref<256x4xf32, #tpu.memory_space<vmem>>) attributes {dimension_semantics = [#tpu.dimension_semantics<parallel>], iteration_bounds = array<i64: 2>, scalar_prefetch = 0 : i64, scratch_operands = 0 : i64, tpu.core_type = #tpu.core_type<tc>, window_params = [{transform_indices = @transform_0, window_bounds = array<i64: 256, 32>}, {pipeline_mode = #tpu.pipeline_mode<synchronous>, transform_indices = @transform_1, window_bounds = array<i64: 32, 128>}, {pipeline_mode = #tpu.pipeline_mode<synchronous>, transform_indices = @transform_2, window_bounds = array<i64: 1, 128>}, {pipeline_mode = #tpu.pipeline_mode<synchronous>, transform_indices = @transform_3, window_bounds = array<i64: 128, 4>}, {pipeline_mode = #tpu.pipeline_mode<synchronous>, transform_indices = @transform_4, window_bounds = array<i64: 1, 4>}, {transform_indices = @transform_5, window_bounds = array<i64: 256, 4>}]} {
    %c0 = arith.constant 0 : index
    %c0_0 = arith.constant 0 : index
    %0 = vector.load %arg1[%c0, %c0_0] : memref<256x32xf32, #tpu.memory_space<vmem>>, vector<256x32xf32>
    %1 = arith.truncf %0 : vector<256x32xf32> to vector<256x32xbf16>
    %c0_1 = arith.constant 0 : index
    %c0_2 = arith.constant 0 : index
    %2 = vector.load %arg2[%c0_1, %c0_2] : memref<32x128xbf16, #tpu.memory_space<vmem>>, vector<32x128xbf16>
    %cst = arith.constant dense<0.000000e+00> : vector<256x128xf32>
    %3 = tpu.matmul %1, %2, %cst {dimension_numbers = #tpu.dot_dimension_numbers<[1], [0], [0], [1], [0, 0, 1, 1], [], []>} : vector<256x32xbf16>, vector<32x128xbf16>, vector<256x128xf32> -> vector<256x128xf32>
    %c0_3 = arith.constant 0 : index
    %c0_4 = arith.constant 0 : index
    %4 = vector.load %arg3[%c0_3, %c0_4] : memref<1x128xf32, #tpu.memory_space<vmem>>, vector<1x128xf32>
    %5 = vector.broadcast %4 : vector<1x128xf32> to vector<256x128xf32>
    %6 = arith.addf %3, %5 : vector<256x128xf32>
    %cst_5 = arith.constant 0.000000e+00 : f32
    %7 = vector.broadcast %cst_5 : f32 to vector<256x128xf32>
    %8 = arith.maximumf %6, %7 : vector<256x128xf32>
    %9 = arith.truncf %8 : vector<256x128xf32> to vector<256x128xbf16>
    %c0_6 = arith.constant 0 : index
    %c0_7 = arith.constant 0 : index
    %10 = vector.load %arg4[%c0_6, %c0_7] : memref<128x4xbf16, #tpu.memory_space<vmem>>, vector<128x4xbf16>
    %cst_8 = arith.constant dense<0.000000e+00> : vector<256x4xf32>
    %11 = tpu.matmul %9, %10, %cst_8 {dimension_numbers = #tpu.dot_dimension_numbers<[1], [0], [0], [1], [0, 0, 1, 1], [], []>} : vector<256x128xbf16>, vector<128x4xbf16>, vector<256x4xf32> -> vector<256x4xf32>
    %c0_9 = arith.constant 0 : index
    %c0_10 = arith.constant 0 : index
    %12 = vector.load %arg5[%c0_9, %c0_10] : memref<1x4xf32, #tpu.memory_space<vmem>>, vector<1x4xf32>
    %13 = vector.broadcast %12 : vector<1x4xf32> to vector<256x4xf32>
    %14 = arith.addf %11, %13 : vector<256x4xf32>
    %c0_11 = arith.constant 0 : index
    %c0_12 = arith.constant 0 : index
    %15 = vector.load %arg6[%c0_11, %c0_12] : memref<256x4xf32, #tpu.memory_space<vmem>>, vector<256x4xf32>
    tpu.vector_store %arg6[%c0_11, %c0_12], %14 {strides = array<i32>} : memref<256x4xf32, #tpu.memory_space<vmem>>, vector<256x4xf32>,
    return
  }
  func.func @transform_0(%arg0: i32) -> (i32, i32) {
    %c0_i32 = arith.constant 0 : i32
    %c0_i32_0 = arith.constant 0 : i32
    return %arg0, %c0_i32 : i32, i32
  }
  func.func @transform_1(%arg0: i32) -> (i32, i32) {
    %c0_i32 = arith.constant 0 : i32
    %c0_i32_0 = arith.constant 0 : i32
    %c0_i32_1 = arith.constant 0 : i32
    return %c0_i32, %c0_i32_0 : i32, i32
  }
  func.func @transform_2(%arg0: i32) -> (i32, i32) {
    %c0_i32 = arith.constant 0 : i32
    %c0_i32_0 = arith.constant 0 : i32
    %c0_i32_1 = arith.constant 0 : i32
    return %c0_i32, %c0_i32_0 : i32, i32
  }
  func.func @transform_3(%arg0: i32) -> (i32, i32) {
    %c0_i32 = arith.constant 0 : i32
    %c0_i32_0 = arith.constant 0 : i32
    %c0_i32_1 = arith.constant 0 : i32
    return %c0_i32, %c0_i32_0 : i32, i32
  }
  func.func @transform_4(%arg0: i32) -> (i32, i32) {
    %c0_i32 = arith.constant 0 : i32
    %c0_i32_0 = arith.constant 0 : i32
    %c0_i32_1 = arith.constant 0 : i32
    return %c0_i32, %c0_i32_0 : i32, i32
  }
  func.func @transform_5(%arg0: i32) -> (i32, i32) {
    %c0_i32 = arith.constant 0 : i32
    %c0_i32_0 = arith.constant 0 : i32
    return %arg0, %c0_i32 : i32, i32
  }
}

</mosaic_0001>

<bundles_post_ra>
// kernel: neural_net2_forward.1
= control target key start
LH: loop header
LB: loop body
LE: loop exit
PB: predicated region body
PF: predicated region fallthrough
CT: control target
= control target key end

     0   :  { %s1116_s18 = smov 0   ;;  %s1360_s0 = inlined_call_operand.vmem [shape: f32[512,32], index: 0, kind: input, shape index: {}]   ;;  %s1361_s1 = inlined_call_operand.vmem [shape: bf16[32,128], index: 1, kind: input, shape index: {}]   ;;  %s1362_s2 = inlined_call_operand.vmem [shape: f32[1,128], index: 2, kind: input, shape index: {}]   ;;  %s1363_s3 = inlined_call_operand.vmem [shape: bf16[128,4], index: 3, kind: input, shape index: {}]   ;;  %s1364_s4 = inlined_call_operand.vmem [shape: f32[1,4], index: 4, kind: input, shape index: {}]   ;;  %s1365_s5 = inlined_call_operand.vmem [shape: f32[512,4], index: 5, kind: output, shape index: {}]  }
   0x1 LB: > { %s879_s19 = sadd.s32 4294967295, %s1084_s18   ;;  %p883_p0 = scmp.ge.s32.totalorder %s1084_s18, 1  ;;  %s1084_s18 = sphi %s1116_s18, %s15_s18  }
   0x2   : > { %p188_p1 = scmp.lt.s32.totalorder %s1084_s18, 3 }
   0x4   : > { %p189_p2 = pnand %p883_p0, %p188_p1 }
   0x5   : > { %s884_s22 = sshll.u32 (!%p189_p2), %s879_s19, 5 }
   0x6   : > { %192 = sbr.rel (%p189_p2) target bundleno = 484 (0x1e4), region = 40  ;;  %p217_p3 = scmp.lt.s32.totalorder (!%p189_p2), %s884_s22, 63 }
   0xb   : > { %v1068_v0 = vld [vmem:[%s1361_s1 + $0x8] sm:$0xff]   ;;  %v1069_v1 = vld [vmem:[%s1361_s1] sm:$0xff]   ;;  %v1070_v2 = vld [vmem:[%s1363_s3 + $0x38] sm:$0xff]   ;;  %s1367_s22 = smov (!%p217_p3, %s884_s22), 63  ;;  %vm300_vm0 = vcmask 261120   ;;  %vm790_vm1 = vcmask 31744  }
   0xc   : > { %960 = vmatprep.subr.bf16.mxu0 %v1068_v0  ;;  %v1071_v3 = vld [vmem:[%s1363_s3 + $0x30] sm:$0xff]   ;;  %1044 = vmatprep.subr.bf16.mxu1 %v1070_v2  ;;  %s885_s29 = sshll.u32 %s1367_s22, 3  ;;  %v1072_v4 = vld [vmem:[%s1363_s3 + $0x28] sm:$0xff]   ;;  %v1073_v16 = vld [vmem:[%s1363_s3 + $0x20] sm:$0xff]  }
   0xd   : > { %961 = vmatpush3.bf16.msra.mxu0 %v1068_v0  ;;  %1052 = vmatpush3.bf16.msra.mxu1 %v1070_v2  ;;  %s1144_s7 = scalar_lea.vmem %s1360_s0, %s885_s29  ;;  %v1074_v21 = vld [vmem:[%s1363_s3 + $0x18] sm:$0xff]   ;;  %v1075_v55 = vld [vmem:[%s1363_s3 + $0x10] sm:$0xff]   ;;  %v1076_v56 = vld [vmem:[%s1363_s3 + $0x8] sm:$0xff]   ;;  %s1259_s28 = scalar_lea.vmem %s1365_s5, %s885_s29 }
   0xe   : > { %962 = vmatprep.subr.bf16.mxu0 %v1069_v1  ;;  %1045 = vmatprep.subr.bf16.mxu1 %v1071_v3  ;;  %v229_v5 = vld [vmem:[%s1144_s7] sm:$0xff]  ;;  %v230_v6 = vld [vmem:[%s1144_s7 + $0x8] sm:$0xff]  ;;  %v231_v7 = vld [vmem:[%s1144_s7 + $0x10] sm:$0xff] }
   0xf   : > { %v261_v8 = vpack.c.bf16 %v230_v6, %v229_v5  ;;  %v232_v9 = vld [vmem:[%s1144_s7 + $0x18] sm:$0xff]  ;;  %v233_v10 = vld [vmem:[%s1144_s7 + $0x20] sm:$0xff]  ;;  %v234_v11 = vld [vmem:[%s1144_s7 + $0x28] sm:$0xff] }
  0x10   : > { %v262_v12 = vpack.c.bf16 %v232_v9, %v231_v7  ;;  %v263_v13 = vpack.c.bf16 %v234_v11, %v233_v10  ;;  %v235_v14 = vld [vmem:[%s1144_s7 + $0x30] sm:$0xff]  ;;  %v236_v15 = vld [vmem:[%s1144_s7 + $0x38] sm:$0xff]  ;;  %v237_v17 = vld [vmem:[%s1144_s7 + $0x40] sm:$0xff] }
  0x11   : > { %963 = vmatpush3.bf16.msra.mxu0 %v1069_v1  ;;  %1053 = vmatpush3.bf16.msra.mxu1 %v1071_v3  ;;  %v238_v18 = vld [vmem:[%s1144_s7 + $0x48] sm:$0xff]  ;;  %v264_v19 = vpack.c.bf16 %v236_v15, %v235_v14  ;;  %v239_v22 = vld [vmem:[%s1144_s7 + $0x50] sm:$0xff]  ;;  %v240_v23 = vld [vmem:[%s1144_s7 + $0x58] sm:$0xff] }
  0x12   : > { %996 = vmatprep.subr.bf16.mxu0 %v1070_v2  ;;  %964 = vmatprep.mubr.msk.bf16.mxu0 %vm300_vm0, %v261_v8  ;;  %v265_v20 = vpack.c.bf16 %v238_v18, %v237_v17  ;;  %v241_v24 = vld [vmem:[%s1144_s7 + $0x60] sm:$0xff]  ;;  %v242_v25 = vld [vmem:[%s1144_s7 + $0x68] sm:$0xff]  ;;  %v266_v26 = vpack.c.bf16 %v240_v23, %v239_v22  ;;  %v243_v28 = vld [vmem:[%s1144_s7 + $0x70] sm:$0xff] }
  0x13   : > { %1046 = vmatprep.subr.bf16.mxu1 %v1072_v4  ;;  %v267_v27 = vpack.c.bf16 %v242_v25, %v241_v24  ;;  %v244_v29 = vld [vmem:[%s1144_s7 + $0x78] sm:$0xff]  ;;  %v245_v30 = vld [vmem:[%s1144_s7 + $0x80] sm:$0xff]  ;;  %v246_v31 = vld [vmem:[%s1144_s7 + $0x88] sm:$0xff] }
  0x14   : > { %965 = vmatmul.mubr.msk.bf16.vlgmr.msra.gmra.mxu0 %vm300_vm0, %v262_v12  ;;  %v268_v32 = vpack.c.bf16 %v244_v29, %v243_v28  ;;  %v269_v33 = vpack.c.bf16 %v246_v31, %v245_v30  ;;  %v247_v34 = vld [vmem:[%s1144_s7 + $0x90] sm:$0xff]  ;;  %v248_v35 = vld [vmem:[%s1144_s7 + $0x98] sm:$0xff]  ;;  %v249_v36 = vld [vmem:[%s1144_s7 + $0xa0] sm:$0xff] }
  0x15   : > { %968 = vmatprep.mubr.msk.bf16.mxu0 %vm300_vm0, %v263_v13  ;;  %997 = vmatpush3.bf16.msra.mxu0 %v1070_v2  ;;  %v250_v37 = vld [vmem:[%s1144_s7 + $0xa8] sm:$0xff]  ;;  %v270_v38 = vpack.c.bf16 %v248_v35, %v247_v34  ;;  %v251_v40 = vld [vmem:[%s1144_s7 + $0xb0] sm:$0xff]  ;;  %v252_v41 = vld [vmem:[%s1144_s7 + $0xb8] sm:$0xff] }
  0x16   : > { %998 = vmatprep.subr.bf16.mxu0 %v1071_v3  ;;  %1054 = vmatpush3.bf16.msra.mxu1 %v1072_v4  ;;  %v271_v39 = vpack.c.bf16 %v250_v37, %v249_v36  ;;  %v253_v42 = vld [vmem:[%s1144_s7 + $0xc0] sm:$0xff]  ;;  %v254_v43 = vld [vmem:[%s1144_s7 + $0xc8] sm:$0xff]  ;;  %v272_v44 = vpack.c.bf16 %v252_v41, %v251_v40  ;;  %v255_v46 = vld [vmem:[%s1144_s7 + $0xd0] sm:$0xff] }
  0x17   : > { %1047 = vmatprep.subr.bf16.mxu1 %v1073_v16  ;;  %v273_v45 = vpack.c.bf16 %v254_v43, %v253_v42  ;;  %v256_v47 = vld [vmem:[%s1144_s7 + $0xd8] sm:$0xff]  ;;  %v257_v48 = vld [vmem:[%s1144_s7 + $0xe0] sm:$0xff]  ;;  %v258_v49 = vld [vmem:[%s1144_s7 + $0xe8] sm:$0xff] }
  0x18   : > { %v274_v50 = vpack.c.bf16 %v256_v47, %v255_v46  ;;  %v275_v51 = vpack.c.bf16 %v258_v49, %v257_v48  ;;  %v259_v52 = vld [vmem:[%s1144_s7 + $0xf0] sm:$0xff]  ;;  %v260_v53 = vld [vmem:[%s1144_s7 + $0xf8] sm:$0xff]  ;;  %v1077_v57 = vld [vmem:[%s1363_s3] sm:$0xff]  }
  0x19   : > { %999 = vmatpush3.bf16.msra.mxu0 %v1071_v3  ;;  %v276_v54 = vpack.c.bf16 %v260_v53, %v259_v52  ;;  %v1215_v60 = vld [vmem:[%s1362_s2] ss:$0 sm:$0xff] }
  0x1a   : > { %1000 = vmatprep.subr.bf16.mxu0 %v1072_v4  ;;  %1055 = vmatpush3.bf16.msra.mxu1 %v1073_v16 }
  0x1b   : > { %1048 = vmatprep.subr.bf16.mxu1 %v1074_v21 }
  0x1c   : > { %969 = vmatmul.mubr.msk.bf16.gmra.mxu0 %vm300_vm0, %v264_v19 }
  0x1d   : > { %972 = vmatprep.mubr.msk.bf16.mxu0 %vm300_vm0, %v265_v20  ;;  %1001 = vmatpush3.bf16.msra.mxu0 %v1072_v4 }
  0x1e   : > { %1002 = vmatprep.subr.bf16.mxu0 %v1073_v16  ;;  %1056 = vmatpush3.bf16.msra.mxu1 %v1074_v21 }
  0x1f   : > { %1049 = vmatprep.subr.bf16.mxu1 %v1075_v55 }
  0x21   : > { %1003 = vmatpush3.bf16.msra.mxu0 %v1073_v16 }
  0x22   : > { %1004 = vmatprep.subr.bf16.mxu0 %v1074_v21  ;;  %1057 = vmatpush3.bf16.msra.mxu1 %v1075_v55 }
  0x23   : > { %1050 = vmatprep.subr.bf16.mxu1 %v1076_v56 }
  0x24   : > { %973 = vmatmul.mubr.msk.bf16.gmra.mxu0 %vm300_vm0, %v266_v26 }
  0x25   : > { %976 = vmatprep.mubr.msk.bf16.mxu0 %vm300_vm0, %v267_v27  ;;  %1005 = vmatpush3.bf16.msra.mxu0 %v1074_v21 }
  0x26   : > { %1006 = vmatprep.subr.bf16.mxu0 %v1075_v55  ;;  %1058 = vmatpush3.bf16.msra.mxu1 %v1076_v56 }
  0x27   : > { %1051 = vmatprep.subr.bf16.mxu1 %v1077_v57 }
  0x29   : > { %1007 = vmatpush3.bf16.msra.mxu0 %v1075_v55 }
  0x2a   : > { %1008 = vmatprep.subr.bf16.mxu0 %v1076_v56  ;;  %1059 = vmatpush3.bf16.msra.mxu1 %v1077_v57 }
  0x2c   : > { %977 = vmatmul.mubr.msk.bf16.gmra.mxu0 %vm300_vm0, %v268_v32 }
  0x2d   : > { %980 = vmatprep.mubr.msk.bf16.mxu0 %vm300_vm0, %v269_v33  ;;  %1009 = vmatpush3.bf16.msra.mxu0 %v1076_v56 }
  0x2e   : > { %1010 = vmatprep.subr.bf16.mxu0 %v1077_v57 }
  0x31   : > { %1011 = vmatpush3.bf16.msra.mxu0 %v1077_v57 }
  0x34   : > { %981 = vmatmul.mubr.msk.bf16.gmra.mxu0 %vm300_vm0, %v270_v38 }
  0x35   : > { %984 = vmatprep.mubr.msk.bf16.mxu0 %vm300_vm0, %v271_v39 }
  0x3c   : > { %985 = vmatmul.mubr.msk.bf16.gmra.mxu0 %vm300_vm0, %v272_v44 }
  0x3d   : > { %988 = vmatprep.mubr.msk.bf16.mxu0 %vm300_vm0, %v273_v45 }
  0x44   : > { %989 = vmatmul.mubr.msk.bf16.gmra.mxu0 %vm300_vm0, %v274_v50 }
  0x45   : > { %992 = vmatprep.mubr.msk.bf16.mxu0 %vm300_vm0, %v275_v51 }
  0x4c   : > { %993 = vmatmul.mubr.msk.bf16.gmra.mxu0 %vm300_vm0, %v276_v54 }
  0xd4   : > { %v966_v58 = vpop.f32.mrf.mxu0 }
  0xd5   : > { %v392_v0 = vadd.f32 %v966_v58, %v1215_v60 }
  0xd6   : > { %v383_v59 = vpop.f32.mrf.mxu0 }
  0xd7   : > { %v384_v62 = vadd.f32 %v1215_v60, %v383_v59  ;;  %v512_v7 = vmax.f32 %v392_v0, 0.0 }
  0xd8   : > { %v967_v61 = vpop.f32.mrf.mxu0 }
  0xd9   : > { %v395_v63 = vadd.f32 %v967_v61, %v1215_v60  ;;  %v510_v5 = vmax.f32 %v384_v62, 0.0 }
  0xda   : > { %v386_v1 = vpop.f32.mrf.mxu0 }
  0xdb   : > { %v387_v2 = vadd.f32 %v1215_v60, %v386_v1  ;;  %v513_v3 = vmax.f32 %v395_v63, 0.0 }
  0xdc   : > { %v970_v4 = vpop.f32.mrf.mxu0 }
  0xdd   : > { %v511_v6 = vmax.f32 %v387_v2, 0.0  ;;  %v543_v10 = vpack.c.bf16 %v513_v3, %v512_v7  ;;  %v408_v14 = vadd.f32 %v970_v4, %v1215_v60 }
  0xde   : > { %v399_v8 = vpop.f32.mrf.mxu0 }
  0xdf   : > { %v542_v9 = vpack.c.bf16 %v511_v6, %v510_v5  ;;  %v400_v12 = vadd.f32 %v1215_v60, %v399_v8  ;;  %v516_v21 = vmax.f32 %v408_v14, 0.0 }
  0xe0   : > { %v971_v11 = vpop.f32.mrf.mxu0 }
  0xe1   : > { %v411_v13 = vadd.f32 %v971_v11, %v1215_v60  ;;  %1012 = vmatprep.mubr.bf16.mxu0 %v542_v9  ;;  %v514_v19 = vmax.f32 %v400_v12, 0.0 }
  0xe2   : > { %v402_v15 = vpop.f32.mrf.mxu0  ;;  %1013 = vmatmul.mubr.bf16.vlgmr.msra.gmra.mxu0 %v543_v10 }
  0xe3   : > { %v403_v16 = vadd.f32 %v1215_v60, %v402_v15  ;;  %v517_v17 = vmax.f32 %v411_v13, 0.0 }
  0xe4   : > { %v974_v18 = vpop.f32.mrf.mxu0 }
  0xe5   : > { %v515_v20 = vmax.f32 %v403_v16, 0.0  ;;  %v545_v24 = vpack.c.bf16 %v517_v17, %v516_v21  ;;  %v424_v28 = vadd.f32 %v974_v18, %v1215_v60 }
  0xe6   : > { %v415_v22 = vpop.f32.mrf.mxu0 }
  0xe7   : > { %v544_v23 = vpack.c.bf16 %v515_v20, %v514_v19  ;;  %v416_v26 = vadd.f32 %v1215_v60, %v415_v22  ;;  %v520_v35 = vmax.f32 %v424_v28, 0.0 }
  0xe8   : > { %v975_v25 = vpop.f32.mrf.mxu0 }
  0xe9   : > { %v427_v27 = vadd.f32 %v975_v25, %v1215_v60  ;;  %1016 = vmatprep.mubr.bf16.mxu1 %v544_v23  ;;  %v518_v33 = vmax.f32 %v416_v26, 0.0 }
  0xea   : > { %v418_v29 = vpop.f32.mrf.mxu0  ;;  %1017 = vmatmul.mubr.bf16.vlgmr.msra.gmra.mxu1 %v545_v24 }
  0xeb   : > { %v419_v30 = vadd.f32 %v1215_v60, %v418_v29  ;;  %v521_v31 = vmax.f32 %v427_v27, 0.0 }
  0xec   : > { %v978_v32 = vpop.f32.mrf.mxu0 }
  0xed   : > { %v519_v34 = vmax.f32 %v419_v30, 0.0  ;;  %v547_v38 = vpack.c.bf16 %v521_v31, %v520_v35  ;;  %v440_v42 = vadd.f32 %v978_v32, %v1215_v60 }
  0xee   : > { %v431_v36 = vpop.f32.mrf.mxu0 }
  0xef   : > { %v546_v37 = vpack.c.bf16 %v519_v34, %v518_v33  ;;  %v432_v40 = vadd.f32 %v1215_v60, %v431_v36  ;;  %v524_v49 = vmax.f32 %v440_v42, 0.0 }
  0xf0   : > { %v979_v39 = vpop.f32.mrf.mxu0 }
  0xf1   : > { %v443_v41 = vadd.f32 %v979_v39, %v1215_v60  ;;  %1020 = vmatprep.mubr.bf16.mxu1 %v546_v37  ;;  %v522_v47 = vmax.f32 %v432_v40, 0.0 }
  0xf2   : > { %v434_v43 = vpop.f32.mrf.mxu0  ;;  %1021 = vmatmul.mubr.bf16.gmra.mxu1 %v547_v38 }
  0xf3   : > { %v435_v44 = vadd.f32 %v1215_v60, %v434_v43  ;;  %v525_v45 = vmax.f32 %v443_v41, 0.0 }
  0xf4   : > { %v982_v46 = vpop.f32.mrf.mxu0 }
  0xf5   : > { %v523_v48 = vmax.f32 %v435_v44, 0.0  ;;  %v549_v52 = vpack.c.bf16 %v525_v45, %v524_v49  ;;  %v456_v56 = vadd.f32 %v982_v46, %v1215_v60  ;;  %v1252_v44 = vld [vmem:[%s1364_s4] ss:$0 sm:$0xff] }
  0xf6   : > { %v447_v50 = vpop.f32.mrf.mxu0 }
  0xf7   : > { %v548_v51 = vpack.c.bf16 %v523_v48, %v522_v47  ;;  %v448_v54 = vadd.f32 %v1215_v60, %v447_v50  ;;  %v528_v0 = vmax.f32 %v456_v56, 0.0 }
  0xf8   : > { %v983_v53 = vpop.f32.mrf.mxu0 }
  0xf9   : > { %v459_v55 = vadd.f32 %v983_v53, %v1215_v60  ;;  %1024 = vmatprep.mubr.bf16.mxu1 %v548_v51  ;;  %v526_v62 = vmax.f32 %v448_v54, 0.0 }
  0xfa   : > { %v450_v57 = vpop.f32.mrf.mxu0  ;;  %1025 = vmatmul.mubr.bf16.gmra.mxu1 %v549_v52 }
  0xfb   : > { %v451_v58 = vadd.f32 %v1215_v60, %v450_v57  ;;  %v529_v59 = vmax.f32 %v459_v55, 0.0 }
  0xfc   : > { %v986_v61 = vpop.f32.mrf.mxu0 }
  0xfd   : > { %v527_v63 = vmax.f32 %v451_v58, 0.0  ;;  %v551_v3 = vpack.c.bf16 %v529_v59, %v528_v0  ;;  %v472_v7 = vadd.f32 %v986_v61, %v1215_v60 }
  0xfe   : > { %v463_v1 = vpop.f32.mrf.mxu0 }
  0xff   : > { %v550_v2 = vpack.c.bf16 %v527_v63, %v526_v62  ;;  %v464_v5 = vadd.f32 %v1215_v60, %v463_v1  ;;  %v532_v14 = vmax.f32 %v472_v7, 0.0 }
 0x100   : > { %v987_v4 = vpop.f32.mrf.mxu0 }
 0x101   : > { %v475_v6 = vadd.f32 %v987_v4, %v1215_v60  ;;  %1028 = vmatprep.mubr.bf16.mxu1 %v550_v2  ;;  %v530_v12 = vmax.f32 %v464_v5, 0.0 }
 0x102   : > { %v466_v8 = vpop.f32.mrf.mxu0  ;;  %1029 = vmatmul.mubr.bf16.gmra.mxu1 %v551_v3 }
 0x103   : > { %v467_v9 = vadd.f32 %v1215_v60, %v466_v8  ;;  %v533_v10 = vmax.f32 %v475_v6, 0.0 }
 0x104   : > { %v990_v11 = vpop.f32.mrf.mxu0 }
 0x105   : > { %v531_v13 = vmax.f32 %v467_v9, 0.0  ;;  %v553_v17 = vpack.c.bf16 %v533_v10, %v532_v14  ;;  %v488_v21 = vadd.f32 %v990_v11, %v1215_v60 }
 0x106   : > { %v479_v15 = vpop.f32.mrf.mxu0 }
 0x107   : > { %v552_v16 = vpack.c.bf16 %v531_v13, %v530_v12  ;;  %v480_v19 = vadd.f32 %v1215_v60, %v479_v15  ;;  %v536_v28 = vmax.f32 %v488_v21, 0.0 }
 0x108   : > { %v991_v18 = vpop.f32.mrf.mxu0 }
 0x109   : > { %v491_v20 = vadd.f32 %v991_v18, %v1215_v60  ;;  %1032 = vmatprep.mubr.bf16.mxu1 %v552_v16  ;;  %v534_v26 = vmax.f32 %v480_v19, 0.0 }
 0x10a   : > { %v482_v22 = vpop.f32.mrf.mxu0  ;;  %1033 = vmatmul.mubr.bf16.gmra.mxu1 %v553_v17 }
 0x10b   : > { %v483_v23 = vadd.f32 %v1215_v60, %v482_v22  ;;  %v537_v24 = vmax.f32 %v491_v20, 0.0 }
 0x10c   : > { %v994_v25 = vpop.f32.mrf.mxu0 }
 0x10d   : > { %v535_v27 = vmax.f32 %v483_v23, 0.0  ;;  %v555_v31 = vpack.c.bf16 %v537_v24, %v536_v28  ;;  %v504_v35 = vadd.f32 %v994_v25, %v1215_v60 }
 0x10e   : > { %v495_v29 = vpop.f32.mrf.mxu0 }
 0x10f   : > { %v554_v30 = vpack.c.bf16 %v535_v27, %v534_v26  ;;  %v496_v33 = vadd.f32 %v1215_v60, %v495_v29  ;;  %v540_v41 = vmax.f32 %v504_v35, 0.0 }
 0x110   : > { %v995_v32 = vpop.f32.mrf.mxu0 }
 0x111   : > { %v507_v34 = vadd.f32 %v995_v32, %v1215_v60  ;;  %1036 = vmatprep.mubr.bf16.mxu1 %v554_v30  ;;  %v538_v39 = vmax.f32 %v496_v33, 0.0 }
 0x112   : > { %v498_v36 = vpop.f32.mrf.mxu0  ;;  %1037 = vmatmul.mubr.bf16.gmra.mxu1 %v555_v31 }
 0x113   : > { %v499_v37 = vadd.f32 %v1215_v60, %v498_v36  ;;  %v541_v38 = vmax.f32 %v507_v34, 0.0 }
 0x115   : > { %v539_v40 = vmax.f32 %v499_v37, 0.0  ;;  %v557_v43 = vpack.c.bf16 %v541_v38, %v540_v41 }
 0x117   : > { %v556_v42 = vpack.c.bf16 %v539_v40, %v538_v39 }
 0x119   : > { %1040 = vmatprep.mubr.bf16.mxu1 %v556_v42 }
 0x11a   : > { %1041 = vmatmul.mubr.bf16.gmra.mxu1 %v557_v43 }
 0x1a2   : > { %v1014_v60 = vpop.f32.mrf.mxu0 }
 0x1a3   : > { %v672_v45 = vadd.f32 %v1014_v60, %v1252_v44 }
 0x1a4   : > { %v663_v46 = vpop.f32.mrf.mxu0 }
 0x1a5   : > { %793 = vst.msk [vmem:[%s1259_s28 + $0x10] sm:$0xff] %vm790_vm1, %v672_v45  ;;  %v664_v47 = vadd.f32 %v1252_v44, %v663_v46 }
 0x1a6   : > { %v1015_v48 = vpop.f32.mrf.mxu0 }
 0x1a7   : > { %791 = vst.msk [vmem:[%s1259_s28] sm:$0xff] %vm790_vm1, %v664_v47  ;;  %v675_v49 = vadd.f32 %v1015_v48, %v1252_v44 }
 0x1a8   : > { %v666_v50 = vpop.f32.mrf.mxu0 }
 0x1a9   : > { %794 = vst.msk [vmem:[%s1259_s28 + $0x18] sm:$0xff] %vm790_vm1, %v675_v49  ;;  %v667_v51 = vadd.f32 %v1252_v44, %v666_v50 }
 0x1aa   : > { %v1018_v52 = vpop.f32.mrf.mxu1 }
 0x1ab   : > { %792 = vst.msk [vmem:[%s1259_s28 + $0x8] sm:$0xff] %vm790_vm1, %v667_v51  ;;  %v688_v53 = vadd.f32 %v1018_v52, %v1252_v44 }
 0x1ac   : > { %v679_v54 = vpop.f32.mrf.mxu1 }
 0x1ad   : > { %797 = vst.msk [vmem:[%s1259_s28 + $0x30] sm:$0xff] %vm790_vm1, %v688_v53  ;;  %v680_v55 = vadd.f32 %v1252_v44, %v679_v54 }
 0x1ae   : > { %v1019_v56 = vpop.f32.mrf.mxu1 }
 0x1af   : > { %795 = vst.msk [vmem:[%s1259_s28 + $0x20] sm:$0xff] %vm790_vm1, %v680_v55  ;;  %v691_v57 = vadd.f32 %v1019_v56, %v1252_v44 }
 0x1b0   : > { %v682_v58 = vpop.f32.mrf.mxu1 }
 0x1b1   : > { %798 = vst.msk [vmem:[%s1259_s28 + $0x38] sm:$0xff] %vm790_vm1, %v691_v57  ;;  %v683_v59 = vadd.f32 %v1252_v44, %v682_v58 }
 0x1b2   : > { %v1022_v61 = vpop.f32.mrf.mxu1 }
 0x1b3   : > { %796 = vst.msk [vmem:[%s1259_s28 + $0x28] sm:$0xff] %vm790_vm1, %v683_v59  ;;  %v704_v62 = vadd.f32 %v1022_v61, %v1252_v44 }
 0x1b4   : > { %v695_v63 = vpop.f32.mrf.mxu1 }
 0x1b5   : > { %801 = vst.msk [vmem:[%s1259_s28 + $0x50] sm:$0xff] %vm790_vm1, %v704_v62  ;;  %v696_v0 = vadd.f32 %v1252_v44, %v695_v63 }
 0x1b6   : > { %v1023_v1 = vpop.f32.mrf.mxu1 }
 0x1b7   : > { %799 = vst.msk [vmem:[%s1259_s28 + $0x40] sm:$0xff] %vm790_vm1, %v696_v0  ;;  %v707_v2 = vadd.f32 %v1023_v1, %v1252_v44 }
 0x1b8   : > { %v698_v3 = vpop.f32.mrf.mxu1 }
 0x1b9   : > { %802 = vst.msk [vmem:[%s1259_s28 + $0x58] sm:$0xff] %vm790_vm1, %v707_v2  ;;  %v699_v4 = vadd.f32 %v1252_v44, %v698_v3 }
 0x1ba   : > { %v1026_v5 = vpop.f32.mrf.mxu1 }
 0x1bb   : > { %800 = vst.msk [vmem:[%s1259_s28 + $0x48] sm:$0xff] %vm790_vm1, %v699_v4  ;;  %v720_v6 = vadd.f32 %v1026_v5, %v1252_v44 }
 0x1bc   : > { %v711_v7 = vpop.f32.mrf.mxu1 }
 0x1bd   : > { %805 = vst.msk [vmem:[%s1259_s28 + $0x70] sm:$0xff] %vm790_vm1, %v720_v6  ;;  %v712_v8 = vadd.f32 %v1252_v44, %v711_v7 }
 0x1be   : > { %v1027_v9 = vpop.f32.mrf.mxu1 }
 0x1bf   : > { %803 = vst.msk [vmem:[%s1259_s28 + $0x60] sm:$0xff] %vm790_vm1, %v712_v8  ;;  %v723_v10 = vadd.f32 %v1027_v9, %v1252_v44 }
 0x1c0   : > { %v714_v11 = vpop.f32.mrf.mxu1 }
 0x1c1   : > { %806 = vst.msk [vmem:[%s1259_s28 + $0x78] sm:$0xff] %vm790_vm1, %v723_v10  ;;  %v715_v12 = vadd.f32 %v1252_v44, %v714_v11 }
 0x1c2   : > { %v1030_v13 = vpop.f32.mrf.mxu1 }
 0x1c3   : > { %804 = vst.msk [vmem:[%s1259_s28 + $0x68] sm:$0xff] %vm790_vm1, %v715_v12  ;;  %v736_v14 = vadd.f32 %v1030_v13, %v1252_v44 }
 0x1c4   : > { %v727_v15 = vpop.f32.mrf.mxu1 }
 0x1c5   : > { %809 = vst.msk [vmem:[%s1259_s28 + $0x90] sm:$0xff] %vm790_vm1, %v736_v14  ;;  %v728_v16 = vadd.f32 %v1252_v44, %v727_v15 }
 0x1c6   : > { %v1031_v17 = vpop.f32.mrf.mxu1 }
 0x1c7   : > { %807 = vst.msk [vmem:[%s1259_s28 + $0x80] sm:$0xff] %vm790_vm1, %v728_v16  ;;  %v739_v18 = vadd.f32 %v1031_v17, %v1252_v44 }
 0x1c8   : > { %v730_v19 = vpop.f32.mrf.mxu1 }
 0x1c9   : > { %810 = vst.msk [vmem:[%s1259_s28 + $0x98] sm:$0xff] %vm790_vm1, %v739_v18  ;;  %v731_v20 = vadd.f32 %v1252_v44, %v730_v19 }
 0x1ca   : > { %v1034_v21 = vpop.f32.mrf.mxu1 }
 0x1cb   : > { %808 = vst.msk [vmem:[%s1259_s28 + $0x88] sm:$0xff] %vm790_vm1, %v731_v20  ;;  %v752_v22 = vadd.f32 %v1034_v21, %v1252_v44 }
 0x1cc   : > { %v743_v23 = vpop.f32.mrf.mxu1 }
 0x1cd   : > { %813 = vst.msk [vmem:[%s1259_s28 + $0xb0] sm:$0xff] %vm790_vm1, %v752_v22  ;;  %v744_v24 = vadd.f32 %v1252_v44, %v743_v23 }
 0x1ce   : > { %v1035_v25 = vpop.f32.mrf.mxu1 }
 0x1cf   : > { %811 = vst.msk [vmem:[%s1259_s28 + $0xa0] sm:$0xff] %vm790_vm1, %v744_v24  ;;  %v755_v26 = vadd.f32 %v1035_v25, %v1252_v44 }
 0x1d0   : > { %v746_v27 = vpop.f32.mrf.mxu1 }
 0x1d1   : > { %814 = vst.msk [vmem:[%s1259_s28 + $0xb8] sm:$0xff] %vm790_vm1, %v755_v26  ;;  %v747_v28 = vadd.f32 %v1252_v44, %v746_v27 }
 0x1d2   : > { %v1038_v29 = vpop.f32.mrf.mxu1 }
 0x1d3   : > { %812 = vst.msk [vmem:[%s1259_s28 + $0xa8] sm:$0xff] %vm790_vm1, %v747_v28  ;;  %v768_v30 = vadd.f32 %v1038_v29, %v1252_v44 }
 0x1d4   : > { %v759_v31 = vpop.f32.mrf.mxu1 }
 0x1d5   : > { %817 = vst.msk [vmem:[%s1259_s28 + $0xd0] sm:$0xff] %vm790_vm1, %v768_v30  ;;  %v760_v32 = vadd.f32 %v1252_v44, %v759_v31 }
 0x1d6   : > { %v1039_v33 = vpop.f32.mrf.mxu1 }
 0x1d7   : > { %815 = vst.msk [vmem:[%s1259_s28 + $0xc0] sm:$0xff] %vm790_vm1, %v760_v32  ;;  %v771_v34 = vadd.f32 %v1039_v33, %v1252_v44 }
 0x1d8   : > { %v762_v35 = vpop.f32.mrf.mxu1 }
 0x1d9   : > { %818 = vst.msk [vmem:[%s1259_s28 + $0xd8] sm:$0xff] %vm790_vm1, %v771_v34  ;;  %v763_v36 = vadd.f32 %v1252_v44, %v762_v35 }
 0x1da   : > { %v1042_v37 = vpop.f32.mrf.mxu1 }
 0x1db   : > { %816 = vst.msk [vmem:[%s1259_s28 + $0xc8] sm:$0xff] %vm790_vm1, %v763_v36  ;;  %v784_v38 = vadd.f32 %v1042_v37, %v1252_v44 }
 0x1dc   : > { %v775_v39 = vpop.f32.mrf.mxu1 }
 0x1dd   : > { %821 = vst.msk [vmem:[%s1259_s28 + $0xf0] sm:$0xff] %vm790_vm1, %v784_v38  ;;  %v776_v40 = vadd.f32 %v1252_v44, %v775_v39 }
 0x1de   : > { %v1043_v41 = vpop.f32.mrf.mxu1 }
 0x1df   : > { %819 = vst.msk [vmem:[%s1259_s28 + $0xe0] sm:$0xff] %vm790_vm1, %v776_v40  ;;  %v787_v42 = vadd.f32 %v1043_v41, %v1252_v44 }
 0x1e0   : > { %v778_v43 = vpop.f32.mrf.mxu1 }
 0x1e1   : > { %822 = vst.msk [vmem:[%s1259_s28 + $0xf8] sm:$0xff] %vm790_vm1, %v787_v42  ;;  %v779_v60 = vadd.f32 %v1252_v44, %v778_v43 }
 0x1e3   : > { %820 = vst.msk [vmem:[%s1259_s28 + $0xe8] sm:$0xff] %vm790_vm1, %v779_v60 }
 0x1e4 PF: > { %s15_s18 = sadd.s32 1, %s1084_s18  }
 0x1e5   : > { %p12_p4 = scmp.ge.s32.totalorder %s15_s18, 4  }
 0x1e7   :  { %14 = sbr.rel (!%p12_p4) target bundleno = 1 (0x1), region = 70 }

</bundles_post_ra>
